<compile_context>
chip_gen: v6e
topology: v6e:2x2x1
jax: 0.10.0
libtpu: 0.0.40
codegen_flags: <defaults>
</compile_context>

<pallas_src>
import jax
import jax.numpy as jnp
from jax.experimental import pallas as pl
from jax.experimental.pallas import tpu as pltpu

EPS = 1e-5       # BatchNorm2d default eps
K = 3            # conv kernel size
CIN = 3
COUT = 5


def model_kernel(p_ref, wa_ref, wb_ref, o_ref):
    """One sample. p_ref: (27,9) im2col^T, wa_ref: (5,27), wb_ref: (3,9,5),
    o_ref: (1,5)."""
    patches = p_ref[...]                                    # (27, 9)
    wa = wa_ref[...]                                        # (5, 27)

    # y1 = conv1(x): one MXU matmul -> (Cout=5, Ho*Wo=9)
    y1 = jnp.dot(wa, patches, preferred_element_type=jnp.float32)

    # y2 = bn1(y1): BatchNorm2d(affine=False), training mode, batch of 1
    # -> per-channel stats over the 9 spatial positions (lane-axis reduce).
    mean = jnp.mean(y1, axis=1, keepdims=True)              # (5, 1)
    var = jnp.mean((y1 - mean) ** 2, axis=1, keepdims=True)
    y2 = (y1 - mean) * jax.lax.rsqrt(var + EPS)             # (5, 9)

    # y3 = conv1(y2): output is 1x1, so it degenerates to a mat-vec.
    # TODO(synk): in the original PyTorch module this call is ill-typed
    # (conv1 expects 3 input channels, y2 has 5, so PyTorch raises).  We reuse
    # conv1's weights on the first 3 channels of y2 to keep the pipeline
    # well-defined and runnable (matched by the reference below).
    wb = wb_ref[...]                                        # (3, 9, 5)
    acc = jnp.zeros((1, COUT), jnp.float32)
    for c in range(CIN):                                    # static unroll (3 taps)
        acc = acc + jnp.dot(y2[c:c + 1, :], wb[c],
                            preferred_element_type=jnp.float32)  # (1,9)@(9,5)
    o_ref[...] = acc.astype(o_ref.dtype)                    # lane-dense (1, 5)


def _im2col_T(x):
    """x: (N, Cin, H, W) -> (N, Cin*K*K, Ho*Wo), flat index c*K*K + ki*K + kj."""
    n, cin, h, w = x.shape
    ho, wo = h - K + 1, w - K + 1
    taps = []
    for ki in range(K):
        for kj in range(K):
            taps.append(x[:, :, ki:ki + ho, kj:kj + wo].reshape(n, cin, ho * wo))
    pat = jnp.stack(taps, axis=2)                           # (N, Cin, K*K, Ho*Wo)
    return pat.reshape(n, cin * K * K, ho * wo)


def model_forward(x, w):
    """x: (N, 3, 5, 5) f32, w: (5, 3, 3, 3) f32 -> (N, 5, 1, 1) f32.

    Each sample is one independent forward pass of the module (batch=1),
    processed by one grid step."""
    n, cin, h, wid = x.shape
    ho, wo = h - K + 1, wid - K + 1                         # 3, 3
    p = ho * wo                                             # 9
    cout = w.shape[0]
    ckk = cin * K * K                                       # 27

    # Wrapper-side layout plumbing (no compute hoisted out of the kernel):
    patches = _im2col_T(x)                                  # (N, 27, 9)
    wa = w.reshape(cout, ckk)                               # (5, 27), (o, c*9+ki*3+kj)
    wb = w.reshape(cout, cin, K * K).transpose(1, 2, 0)     # (3, 9, 5), (c, p, o)

    out = pl.pallas_call(
        model_kernel,
        out_shape=jax.ShapeDtypeStruct((n, 1, cout), jnp.float32),
        grid=(n,),
        in_specs=[
            pl.BlockSpec((None, ckk, p), lambda i: (i, 0, 0)),   # per-sample patches
            pl.BlockSpec((cout, ckk), lambda i: (0, 0)),         # shared weight (5,27)
            pl.BlockSpec((cin, p, cout), lambda i: (0, 0, 0)),   # shared weight (3,9,5)
        ],
        out_specs=pl.BlockSpec((None, 1, cout), lambda i: (i, 0, 0)),
        compiler_params=pltpu.CompilerParams(
            dimension_semantics=("parallel",)),
    )(patches, wa, wb)
    return out.reshape(n, cout, 1, 1)                       # back to NCHW


def _reference(x, w):
    """Pure-JAX reference of the same (patched, per-sample) semantics."""
    dn = ('NCHW', 'OIHW', 'NCHW')
    y1 = jax.lax.conv_general_dilated(x, w, (1, 1), 'VALID', dimension_numbers=dn)
    # per-sample stats: each sample is an independent batch-of-1 forward pass
    mean = jnp.mean(y1, axis=(2, 3), keepdims=True)
    var = jnp.mean((y1 - mean) ** 2, axis=(2, 3), keepdims=True)
    y2 = (y1 - mean) / jnp.sqrt(var + EPS)
    y3 = jax.lax.conv_general_dilated(y2[:, :3], w, (1, 1), 'VALID',
                                      dimension_numbers=dn)
    return y3


if __name__ == "__main__":
    key = jax.random.PRNGKey(0)
    kx, kw = jax.random.split(key)
    N = 8
    x = jax.random.normal(kx, (N, 3, 5, 5), dtype=jnp.float32)
    w = jax.random.normal(kw, (5, 3, 3, 3), dtype=jnp.float32) * 0.1  # conv1.weight

    out = jax.block_until_ready(model_forward(x, w))
    ref = jax.block_until_ready(_reference(x, w))

    assert out.shape == (N, 5, 1, 1), out.shape
    assert jnp.allclose(out, ref, rtol=1e-4, atol=1e-4), (out, ref)
    print("KERNEL_OK")
</pallas_src>

<mosaic_0001>
module attributes {stable_mosaic.version = 11 : i64} {
  func.func @model_kernel(%arg0: i32, %arg1: memref<1x27x9xf32, #tpu.memory_space<vmem>>, %arg2: memref<5x27xf32, #tpu.memory_space<vmem>>, %arg3: memref<3x9x5xf32, #tpu.memory_space<vmem>>, %arg4: memref<1x1x5xf32, #tpu.memory_space<vmem>>) attributes {dimension_semantics = [#tpu.dimension_semantics<parallel>], iteration_bounds = array<i64: 8>, scalar_prefetch = 0 : i64, scratch_operands = 0 : i64, tpu.core_type = #tpu.core_type<tc>, window_params = [{transform_indices = @transform_0, window_bounds = array<i64: 1, 27, 9>}, {pipeline_mode = #tpu.pipeline_mode<synchronous>, transform_indices = @transform_1, window_bounds = array<i64: 5, 27>}, {pipeline_mode = #tpu.pipeline_mode<synchronous>, transform_indices = @transform_2, window_bounds = array<i64: 3, 9, 5>}, {transform_indices = @transform_3, window_bounds = array<i64: 1, 1, 5>}]} {
    %c0 = arith.constant 0 : index
    %c0_0 = arith.constant 0 : index
    %c0_1 = arith.constant 0 : index
    %0 = vector.load %arg1[%c0, %c0_0, %c0_1] : memref<1x27x9xf32, #tpu.memory_space<vmem>>, vector<1x27x9xf32>
    %1 = vector.shape_cast %0 : vector<1x27x9xf32> to vector<27x9xf32>
    %c0_2 = arith.constant 0 : index
    %c0_3 = arith.constant 0 : index
    %2 = vector.load %arg2[%c0_2, %c0_3] : memref<5x27xf32, #tpu.memory_space<vmem>>, vector<5x27xf32>
    %cst = arith.constant dense<0.000000e+00> : vector<5x9xf32>
    %3 = tpu.matmul %2, %1, %cst {dimension_numbers = #tpu.dot_dimension_numbers<[1], [0], [0], [1], [0, 0, 1, 1], [], []>} : vector<5x27xf32>, vector<27x9xf32>, vector<5x9xf32> -> vector<5x9xf32>
    %cst_4 = arith.constant dense<0.000000e+00> : vector<5xf32>
    %4 = vector.multi_reduction <add>, %3, %cst_4 [1] : vector<5x9xf32> to vector<5xf32>
    %5 = vector.shape_cast %4 : vector<5xf32> to vector<5x1xf32>
    %cst_5 = arith.constant 9.000000e+00 : f32
    %6 = vector.broadcast %cst_5 : f32 to vector<5x1xf32>
    %7 = arith.divf %5, %6 : vector<5x1xf32>
    %8 = vector.broadcast %7 : vector<5x1xf32> to vector<5x9xf32>
    %9 = arith.subf %3, %8 : vector<5x9xf32>
    %10 = arith.mulf %9, %9 : vector<5x9xf32>
    %cst_6 = arith.constant dense<0.000000e+00> : vector<5xf32>
    %11 = vector.multi_reduction <add>, %10, %cst_6 [1] : vector<5x9xf32> to vector<5xf32>
    %12 = vector.shape_cast %11 : vector<5xf32> to vector<5x1xf32>
    %cst_7 = arith.constant 9.000000e+00 : f32
    %13 = vector.broadcast %cst_7 : f32 to vector<5x1xf32>
    %14 = arith.divf %12, %13 : vector<5x1xf32>
    %15 = vector.broadcast %7 : vector<5x1xf32> to vector<5x9xf32>
    %16 = arith.subf %3, %15 : vector<5x9xf32>
    %cst_8 = arith.constant 9.99999974E-6 : f32
    %17 = vector.broadcast %cst_8 : f32 to vector<5x1xf32>
    %18 = arith.addf %14, %17 : vector<5x1xf32>
    %19 = math.rsqrt %18 : vector<5x1xf32>
    %20 = vector.broadcast %19 : vector<5x1xf32> to vector<5x9xf32>
    %21 = arith.mulf %16, %20 : vector<5x9xf32>
    %c0_9 = arith.constant 0 : index
    %c0_10 = arith.constant 0 : index
    %c0_11 = arith.constant 0 : index
    %22 = vector.load %arg3[%c0_9, %c0_10, %c0_11] : memref<3x9x5xf32, #tpu.memory_space<vmem>>, vector<3x9x5xf32>
    %cst_12 = arith.constant 0.000000e+00 : f32
    %23 = vector.broadcast %cst_12 : f32 to vector<1x5xf32>
    %24 = vector.extract_strided_slice %21 {offsets = [0, 0], sizes = [1, 9], strides = [1, 1]} : vector<5x9xf32> to vector<1x9xf32>
    %25 = vector.extract_strided_slice %22 {offsets = [0, 0, 0], sizes = [1, 9, 5], strides = [1, 1, 1]} : vector<3x9x5xf32> to vector<1x9x5xf32>
    %26 = vector.shape_cast %25 : vector<1x9x5xf32> to vector<9x5xf32>
    %cst_13 = arith.constant dense<0.000000e+00> : vector<1x5xf32>
    %27 = tpu.matmul %24, %26, %cst_13 {dimension_numbers = #tpu.dot_dimension_numbers<[1], [0], [0], [1], [0, 0, 1, 1], [], []>} : vector<1x9xf32>, vector<9x5xf32>, vector<1x5xf32> -> vector<1x5xf32>
    %28 = arith.addf %23, %27 : vector<1x5xf32>
    %29 = vector.extract_strided_slice %21 {offsets = [1, 0], sizes = [1, 9], strides = [1, 1]} : vector<5x9xf32> to vector<1x9xf32>
    %30 = vector.extract_strided_slice %22 {offsets = [1, 0, 0], sizes = [1, 9, 5], strides = [1, 1, 1]} : vector<3x9x5xf32> to vector<1x9x5xf32>
    %31 = vector.shape_cast %30 : vector<1x9x5xf32> to vector<9x5xf32>
    %cst_14 = arith.constant dense<0.000000e+00> : vector<1x5xf32>
    %32 = tpu.matmul %29, %31, %cst_14 {dimension_numbers = #tpu.dot_dimension_numbers<[1], [0], [0], [1], [0, 0, 1, 1], [], []>} : vector<1x9xf32>, vector<9x5xf32>, vector<1x5xf32> -> vector<1x5xf32>
    %33 = arith.addf %28, %32 : vector<1x5xf32>
    %34 = vector.extract_strided_slice %21 {offsets = [2, 0], sizes = [1, 9], strides = [1, 1]} : vector<5x9xf32> to vector<1x9xf32>
    %35 = vector.extract_strided_slice %22 {offsets = [2, 0, 0], sizes = [1, 9, 5], strides = [1, 1, 1]} : vector<3x9x5xf32> to vector<1x9x5xf32>
    %36 = vector.shape_cast %35 : vector<1x9x5xf32> to vector<9x5xf32>
    %cst_15 = arith.constant dense<0.000000e+00> : vector<1x5xf32>
    %37 = tpu.matmul %34, %36, %cst_15 {dimension_numbers = #tpu.dot_dimension_numbers<[1], [0], [0], [1], [0, 0, 1, 1], [], []>} : vector<1x9xf32>, vector<9x5xf32>, vector<1x5xf32> -> vector<1x5xf32>
    %38 = arith.addf %33, %37 : vector<1x5xf32>
    %c0_16 = arith.constant 0 : index
    %c0_17 = arith.constant 0 : index
    %c0_18 = arith.constant 0 : index
    %39 = vector.load %arg4[%c0_16, %c0_17, %c0_18] : memref<1x1x5xf32, #tpu.memory_space<vmem>>, vector<1x1x5xf32>
    %40 = vector.shape_cast %39 : vector<1x1x5xf32> to vector<1x5xf32>
    %41 = vector.shape_cast %38 : vector<1x5xf32> to vector<1x1x5xf32>
    tpu.vector_store %arg4[%c0_16, %c0_17, %c0_18], %41 {strides = array<i32>} : memref<1x1x5xf32, #tpu.memory_space<vmem>>, vector<1x1x5xf32>,
    return
  }
  func.func @transform_0(%arg0: i32) -> (i32, i32, i32) {
    %c0_i32 = arith.constant 0 : i32
    %c0_i32_0 = arith.constant 0 : i32
    %c0_i32_1 = arith.constant 0 : i32
    return %arg0, %c0_i32, %c0_i32_0 : i32, i32, i32
  }
  func.func @transform_1(%arg0: i32) -> (i32, i32) {
    %c0_i32 = arith.constant 0 : i32
    %c0_i32_0 = arith.constant 0 : i32
    %c0_i32_1 = arith.constant 0 : i32
    return %c0_i32, %c0_i32_0 : i32, i32
  }
  func.func @transform_2(%arg0: i32) -> (i32, i32, i32) {
    %c0_i32 = arith.constant 0 : i32
    %c0_i32_0 = arith.constant 0 : i32
    %c0_i32_1 = arith.constant 0 : i32
    %c0_i32_2 = arith.constant 0 : i32
    return %c0_i32, %c0_i32_0, %c0_i32_1 : i32, i32, i32
  }
  func.func @transform_3(%arg0: i32) -> (i32, i32, i32) {
    %c0_i32 = arith.constant 0 : i32
    %c0_i32_0 = arith.constant 0 : i32
    %c0_i32_1 = arith.constant 0 : i32
    return %arg0, %c0_i32, %c0_i32_0 : i32, i32, i32
  }
}

</mosaic_0001>

<bundles_post_ra>
// kernel: tpu_custom_call.1
= control target key start
LH: loop header
LB: loop body
LE: loop exit
PB: predicated region body
PF: predicated region fallthrough
CT: control target
= control target key end

     0   :  { %s657_s12 = smov 0   ;;  %s720_s0 = inlined_call_operand.vmem [shape: f32[8,27,9], index: 0, kind: input, shape index: {}]   ;;  %s721_s1 = inlined_call_operand.vmem [shape: f32[5,27], index: 1, kind: input, shape index: {}]   ;;  %s722_s2 = inlined_call_operand.vmem [shape: f32[3,9,5], index: 2, kind: input, shape index: {}]   ;;  %s723_s3 = inlined_call_operand.vmem [shape: f32[8,1,5], index: 3, kind: output, shape index: {}]  }
   0x1 LB: > { %s551_s13 = sadd.s32 4294967295, %s633_s12   ;;  %p555_p0 = scmp.ge.s32.totalorder %s633_s12, 1  ;;  %s633_s12 = sphi %s657_s12, %s13_s12  }
   0x2   : > { %p137_p1 = scmp.lt.s32.totalorder %s633_s12, 9 }
   0x4   : > { %p138_p2 = pnand %p555_p0, %p137_p1 }
   0x5   : > { %p159_p3 = scmp.lt.s32.totalorder (!%p138_p2), %s551_s13, 7 }
   0x6   : > { %141 = sbr.rel (%p138_p2) target bundleno = 723 (0x2d3), region = 32 }
   0xb   : > { %v635_v0 = vmov 0.0   ;;  %vm636_vm0 = vmmov 0   ;;  %s725_s13 = smov (!%p159_p3, %s551_s13), 7  ;;  %vm176_vm1 = vcmask 1042432   ;;  %v171_v5 = vld [vmem:[%s721_s1] sm:$0x1f] }
   0xc   : > { %583 = vmatprep.subr.mxu0 %v635_v0  ;;  %591 = vmatprep.mubr.msk.f32.mxu0 %vm636_vm0, %v635_v0  ;;  %s568_s14 = sshll.u32 %s725_s13, 5  ;;  %vm172_vm2 = vcmask 220160   ;;  %vm250_vm3 = vcmask 69632   ;;  %v268_v14 = vld [vmem:[%s722_s2 + $0x18] sm:$0x1]  ;;  %vm276_vm4 = vcmask 1040384   ;;  %s166_s7 = scalar_lea.vmem %s723_s3, %s725_s13 }
   0xd   : > { %594 = vmatprep.subr.mxu1 %v635_v0  ;;  %598 = vmatprep.mubr.msk.f32.mxu1 %vm636_vm0, %v635_v0  ;;  %s163_s17 = scalar_lea.vmem %s720_s0, %s568_s14  ;;  %v270_v15 = vld [vmem:[%s722_s2 + $0x28] sm:$0x1]  ;;  %v267_v16 = vld [vmem:[%s722_s2 + $0x10] sm:$0xff]  ;;  %v269_v17 = vld [vmem:[%s722_s2 + $0x20] sm:$0xff]  ;;  %vm273_vm5 = vcmask 72704   ;;  %vm502_vm6 = vcmask 32768  }
   0xe   : > { %v170_v1 = vld [vmem:[%s163_s17 + $0x18] sm:$0x7]  ;;  %v169_v2 = vld [vmem:[%s163_s17 + $0x10] sm:$0xff]  ;;  %v168_v3 = vld [vmem:[%s163_s17 + $0x8] sm:$0xff]  ;;  %595 = vmatpush3.msk.msra.mxu1 %vm276_vm4, %v268_v14 }
   0xf   : > { %584 = vmatpush3.msk.msra.mxu0 %vm176_vm1, %v170_v1  ;;  %v167_v4 = vld [vmem:[%s163_s17] sm:$0xff]  ;;  %596 = vmatprep.subr.mxu1 %v635_v0  ;;  %v266_v24 = vld [vmem:[%s722_s2 + $0x8] sm:$0x1] }
  0x10   : > { %585 = vmatprep.subr.mxu0 %v635_v0  ;;  %597 = vmatpush3.msra.mxu1 %v267_v16  ;;  %v265_v26 = vld [vmem:[%s722_s2] sm:$0xff] }
  0x11   : > { %586 = vmatpush3.msra.mxu0 %v169_v2  ;;  %601 = vmatprep.subr.mxu1 %v635_v0 }
  0x12   : > { %587 = vmatprep.subr.mxu0 %v635_v0 }
  0x13   : > { %588 = vmatpush3.msra.mxu0 %v168_v3 }
  0x14   : > { %589 = vmatprep.subr.mxu0 %v635_v0 }
  0x15   : > { %590 = vmatpush3.msra.mxu0 %v167_v4 }
  0x16   : > { %592 = vmatmul.mubr.msk.f32.vlgmr.msra.gmra.mxu0 %vm172_vm2, %v171_v5  ;;  %608 = vmatprep.subr.mxu0 %v635_v0 }
  0x17   : > { %612 = vmatprep.mubr.msk.f32.mxu0 %vm636_vm0, %v635_v0  ;;  %609 = vmatpush3.msk.msra.mxu0 %vm276_vm4, %v270_v15 }
  0x18   : > { %610 = vmatprep.subr.mxu0 %v635_v0 }
  0x19   : > { %611 = vmatpush3.msra.mxu0 %v269_v17 }
  0xd6   : > { %v246_v6 = vpop.f32.mrf.mxu0 }
  0xd7   : > { %v251_v7 = vsel %vm250_vm3, %v246_v6, 0.0 }
  0xd8   : > { %252 = vadd.xlane.f32.xlu0 %v251_v7  ;;  %v593_v8 = vpop.f32.mrf.mxu0 }
 0x161   : > { %v253_v9 = vpop.xlane.xlu0 %252 }
 0x162   : > { %v255_v10 = vmul.f32 0.11111111, %v253_v9 }
 0x164   : > { %v256_v11 = vsub.f32 %v246_v6, %v255_v10 }
 0x166   : > { %v257_v12 = vmul.f32 %v256_v11, %v256_v11 }
 0x168   : > { %v258_v13 = vsel %vm250_vm3, %v257_v12, 0.0 }
 0x169   : > { %259 = vadd.xlane.f32.xlu0 %v258_v13 }
 0x1f2   : > { %v260_v18 = vpop.xlane.xlu0 %259 }
 0x1f3   : > { %v261_v19 = vmul.f32 0.11111111, %v260_v18 }
 0x1f5   : > { %v262_v20 = vadd.f32 1e-05, %v261_v19 }
 0x1f7   : > { %625 = vrsqrt.f32 %v262_v20 }
 0x204   : > { %v626_v21 = vpop.eup %625 }
 0x205   : > { %v264_v22 = vmul.f32 %v626_v21, %v256_v11 }
 0x207   : > { %v272_v23 = vrot.slane %v264_v22, 1  ;;  %v425_v25 = vrot.slane %v264_v22, 2 }
 0x209   : > { %599 = vmatmul.mubr.msk.f32.vlgmr.msra.gmra.mxu1 %vm273_vm5, %v272_v23  ;;  %613 = vmatmul.mubr.msk.f32.vlgmr.msra.gmra.mxu0 %vm273_vm5, %v425_v25 }
 0x20a   : > { %602 = vmatpush3.msk.msra.mxu1 %vm276_vm4, %v266_v24  ;;  %605 = vmatprep.mubr.msk.f32.mxu1 %vm636_vm0, %v635_v0 }
 0x20b   : > { %603 = vmatprep.subr.mxu1 %v635_v0 }
 0x20c   : > { %604 = vmatpush3.msra.mxu1 %v265_v26 }
 0x20d   : > { %606 = vmatmul.mubr.msk.f32.vlgmr.msra.gmra.mxu1 %vm273_vm5, %v264_v22 }
 0x2c9   : > { %v346_v27 = vpop.f32.mrf.mxu1  ;;  %v497_v28 = vpop.f32.mrf.mxu0 }
 0x2cb   : > { %v600_v29 = vpop.f32.mrf.mxu1  ;;  %v614_v30 = vpop.f32.mrf.mxu0 }
 0x2cd   : > { %v421_v31 = vpop.f32.mrf.mxu1 }
 0x2ce   : > { %v422_v32 = vadd.f32 %v421_v31, %v346_v27 }
 0x2cf   : > { %v607_v33 = vpop.f32.mrf.mxu1 }
 0x2d0   : > { %v501_v34 = vadd.f32 %v497_v28, %v422_v32 }
 0x2d2   : > { %503 = vst.msk [vmem:[%s166_s7] sm:$0x1] %vm502_vm6, %v501_v34 }
 0x2d3 PF: > { %s13_s12 = sadd.s32 1, %s633_s12  }
 0x2d4   : > { %p10_p4 = scmp.ge.s32.totalorder %s13_s12, 10  }
 0x2d6   :  { %12 = sbr.rel (!%p10_p4) target bundleno = 1 (0x1), region = 62 }

</bundles_post_ra>
